<compile_context>
chip_gen: v5e
topology: v5e:2x2
jax: 0.10.0
libtpu: 0.0.40
codegen_flags: <defaults>
</compile_context>

<pallas_src>
import functools

import jax
import jax.numpy as jnp
from jax.experimental import pallas as pl
from jax.experimental.pallas import tpu as pltpu

BN_EPS = 1e-5
_VMEM_FLOOR = 32 * 1024 * 1024     # default scoped limit on v6e/v7x
_VMEM_CEIL = 64 * 1024 * 1024      # v7x physical VMEM per TensorCore


def _round_up(x, m):
    return (x + m - 1) // m * m


def _vmem_budget(nbytes):
    return int(min(max(nbytes, _VMEM_FLOOR), _VMEM_CEIL))


# ---------------------------------------------------------------------------
# Kernel 1: tiled conv matmul (bf16 -> f32) + per-channel sum / sumsq
# ---------------------------------------------------------------------------
def _conv_stats_kernel(patches_ref, w_ref, y_ref, stats_ref):
    i = pl.program_id(0)

    # bf16 x bf16 -> f32 accumulation on the MXU.
    y = jnp.dot(patches_ref[...], w_ref[...],
                preferred_element_type=jnp.float32)
    y_ref[...] = y

    # stats block is resident across the (reduction) M axis: init once.
    @pl.when(i == 0)
    def _init():
        stats_ref[...] = jnp.zeros_like(stats_ref)

    c = y.shape[1]
    upd = jnp.concatenate(
        [jnp.sum(y, axis=0, keepdims=True),        # row 0: per-channel sum
         jnp.sum(y * y, axis=0, keepdims=True),    # row 1: per-channel sumsq
         jnp.zeros((6, c), jnp.float32)],          # pad to an 8-sublane tile
        axis=0)
    stats_ref[...] = stats_ref[...] + upd


def _conv_stats_pallas(patches, w_mat, tm):
    m_pad, k_pad = patches.shape
    c_pad = w_mat.shape[1]
    n_m = m_pad // tm

    vmem_need = (2 * (tm * k_pad * 2 + tm * c_pad * 4)   # double-buffered I/O
                 + k_pad * c_pad * 2                      # resident weights
                 + 8 * c_pad * 4                          # resident stats
                 + (2 << 20))                             # headroom
    flops = 2 * m_pad * k_pad * c_pad
    bytes_accessed = (m_pad * k_pad * 2 + k_pad * c_pad * 2
                      + m_pad * c_pad * 4 + 8 * c_pad * 4)

    return pl.pallas_call(
        _conv_stats_kernel,
        out_shape=(jax.ShapeDtypeStruct((m_pad, c_pad), jnp.float32),
                   jax.ShapeDtypeStruct((8, c_pad), jnp.float32)),
        grid=(n_m,),
        in_specs=[
            pl.BlockSpec((tm, k_pad), lambda i: (i, 0)),      # patches tile
            pl.BlockSpec((k_pad, c_pad), lambda i: (0, 0)),   # weights resident
        ],
        out_specs=(
            pl.BlockSpec((tm, c_pad), lambda i: (i, 0)),      # conv output y
            pl.BlockSpec((8, c_pad), lambda i: (0, 0)),       # stats accumulator
        ),
        compiler_params=pltpu.CompilerParams(
            # M is a reduction axis for the stats accumulator -> "arbitrary".
            dimension_semantics=("arbitrary",),
            vmem_limit_bytes=_vmem_budget(vmem_need),
        ),
        cost_estimate=pl.CostEstimate(flops=flops, transcendentals=0,
                                      bytes_accessed=bytes_accessed),
    )(patches, w_mat)


# ---------------------------------------------------------------------------
# Kernel 2: apply folded batch-norm scale/shift + ReLU (tiled over M)
# ---------------------------------------------------------------------------
def _bn_relu_kernel(y_ref, scale_ref, shift_ref, out_ref):
    out_ref[...] = jnp.maximum(
        y_ref[...] * scale_ref[...] + shift_ref[...], 0.0
    ).astype(out_ref.dtype)


def _bn_relu_pallas(y, scale, shift, tm):
    m_pad, c_pad = y.shape
    n_m = m_pad // tm

    vmem_need = 4 * tm * c_pad * 4 + 2 * c_pad * 4 + (2 << 20)
    bytes_accessed = 2 * m_pad * c_pad * 4 + 2 * c_pad * 4

    return pl.pallas_call(
        _bn_relu_kernel,
        out_shape=jax.ShapeDtypeStruct((m_pad, c_pad), jnp.float32),
        grid=(n_m,),
        in_specs=[
            pl.BlockSpec((tm, c_pad), lambda i: (i, 0)),
            pl.BlockSpec((1, c_pad), lambda i: (0, 0)),
            pl.BlockSpec((1, c_pad), lambda i: (0, 0)),
        ],
        out_specs=pl.BlockSpec((tm, c_pad), lambda i: (i, 0)),
        compiler_params=pltpu.CompilerParams(
            dimension_semantics=("parallel",),
            vmem_limit_bytes=_vmem_budget(vmem_need),
        ),
        cost_estimate=pl.CostEstimate(flops=3 * m_pad * c_pad, transcendentals=0,
                                      bytes_accessed=bytes_accessed),
    )(y, scale, shift)


# ---------------------------------------------------------------------------
# Glue: im2col, padding, weight reshaping, layout conversion (plain JAX)
# ---------------------------------------------------------------------------
def _im2col_nhwc(x_nhwc, kh, kw, stride, padding):
    x = jnp.pad(x_nhwc, ((0, 0), (padding, padding), (padding, padding), (0, 0)))
    N, H, W, C = x.shape
    oh = (H - kh) // stride + 1
    ow = (W - kw) // stride + 1
    cols = []
    for i in range(kh):
        for j in range(kw):
            cols.append(x[:, i:i + oh * stride:stride,
                          j:j + ow * stride:stride, :])          # (N, oh, ow, C)
    p = jnp.stack(cols, axis=3)                                   # (N, oh, ow, kh*kw, C)
    return p.reshape(N * oh * ow, kh * kw * C), (N, oh, ow)


@functools.partial(jax.jit, static_argnames=("stride", "padding", "block_m"))
def convolution_block_forward(x_nchw, conv_w, conv_b, bn_gamma, bn_beta,
                              *, stride=1, padding=1, block_m=512):
    """Equivalent of convolution_block.forward on an NCHW float32 input."""
    Cout, Cin, KH, KW = conv_w.shape

    # Conv bias is a per-channel constant: training-mode BatchNorm subtracts it
    # back out via the batch mean, so it is dropped (do NOT also fold into beta).
    del conv_b

    x_nhwc = jnp.transpose(x_nchw, (0, 2, 3, 1)).astype(jnp.float32)
    patches, (N, oh, ow) = _im2col_nhwc(x_nhwc, KH, KW, stride, padding)
    M, K = patches.shape

    # Padding for TPU-friendly layouts.
    k_pad = _round_up(K, 8)                 # sublane-align the contraction dim
    c_pad = _round_up(Cout, 128)            # lane-dense output / MXU N dim
    tm = min(block_m, _round_up(M, 8))      # row-tile (multiple of 8)
    m_pad = _round_up(M, tm)

    patches = jnp.pad(patches, ((0, m_pad - M), (0, k_pad - K)))
    patches = patches.astype(jnp.bfloat16)  # MXU is bf16-native; f32 accum in-kernel

    # PyTorch conv weight (Cout, Cin, KH, KW) -> (K, Cout), spatial-major /
    # channel-minor to match the im2col ordering; then pad and cast to bf16.
    w_mat = jnp.transpose(conv_w, (2, 3, 1, 0)).reshape(K, Cout).astype(jnp.float32)
    w_mat = jnp.pad(w_mat, ((0, k_pad - K), (0, c_pad - Cout))).astype(jnp.bfloat16)

    gamma = jnp.pad(bn_gamma.astype(jnp.float32), (0, c_pad - Cout))
    beta = jnp.pad(bn_beta.astype(jnp.float32), (0, c_pad - Cout))

    # Pass 1: conv matmul + per-channel sum / sumsq (padded rows are all-zero,
    # so they contribute nothing; divide by the true M below).
    y, stats = _conv_stats_pallas(patches, w_mat, tm)

    sum_y = stats[0]
    sum_y2 = stats[1]
    mean = sum_y / M
    var = jnp.maximum(sum_y2 / M - mean * mean, 0.0)   # biased variance (training BN)
    inv_std = jax.lax.rsqrt(var + BN_EPS)
    scale = (gamma * inv_std).reshape(1, c_pad)
    shift = (beta - mean * gamma * inv_std).reshape(1, c_pad)

    # Pass 2: normalize + affine + ReLU.
    out_flat = _bn_relu_pallas(y, scale, shift, tm)

    out_nhwc = out_flat[:M, :Cout].reshape(N, oh, ow, Cout)
    return jnp.transpose(out_nhwc, (0, 3, 1, 2))  # back to NCHW


# ---------------------------------------------------------------------------
# Pure-JAX f32 reference (for a correctness sanity check)
# ---------------------------------------------------------------------------
def _reference_forward(x_nchw, conv_w, conv_b, bn_gamma, bn_beta,
                       stride=1, padding=1):
    y = jax.lax.conv_general_dilated(
        x_nchw.astype(jnp.float32), conv_w.astype(jnp.float32),
        window_strides=(stride, stride),
        padding=[(padding, padding), (padding, padding)],
        dimension_numbers=("NCHW", "OIHW", "NCHW"))
    y = y + conv_b.reshape(1, -1, 1, 1)
    mean = jnp.mean(y, axis=(0, 2, 3), keepdims=True)
    var = jnp.mean((y - mean) ** 2, axis=(0, 2, 3), keepdims=True)
    y = (y - mean) * jax.lax.rsqrt(var + BN_EPS)
    y = y * bn_gamma.reshape(1, -1, 1, 1) + bn_beta.reshape(1, -1, 1, 1)
    return jnp.maximum(y, 0.0)


# ---------------------------------------------------------------------------
if __name__ == "__main__":
    key = jax.random.PRNGKey(0)
    k_x, k_w, k_b = jax.random.split(key, 3)

    N, Cin, H, W = 2, 4, 16, 16
    Cout, KH, KW = 8, 3, 3

    x = jax.random.normal(k_x, (N, Cin, H, W), dtype=jnp.float32)

    conv_w = 0.1 * jax.random.normal(k_w, (Cout, Cin, KH, KW), dtype=jnp.float32)
    conv_b = 0.05 * jax.random.normal(k_b, (Cout,), dtype=jnp.float32)
    bn_gamma = jnp.ones((Cout,), dtype=jnp.float32)    # PyTorch default init
    bn_beta = jnp.zeros((Cout,), dtype=jnp.float32)

    # block_m=128 -> 4-step grid on this small problem, exercising the
    # multi-tile statistics accumulation path (production default is 512).
    out = convolution_block_forward(x, conv_w, conv_b, bn_gamma, bn_beta,
                                    stride=1, padding=1, block_m=128)
    out = jax.block_until_ready(out)

    ref = _reference_forward(x, conv_w, conv_b, bn_gamma, bn_beta)
    assert out.shape == (N, Cout, H, W), out.shape
    # Tolerance accounts for the intentional bf16 rounding of the matmul
    # inputs (f32 accumulation); the f32 reference is the PyTorch semantics.
    max_err = float(jnp.max(jnp.abs(out - ref)))
    assert jnp.allclose(out, ref, rtol=2e-2, atol=2e-2), max_err

    print("KERNEL_OK")
</pallas_src>

<mosaic_0001>
module attributes {stable_mosaic.version = 11 : i64} {
  func.func @_conv_stats_kernel(%arg0: i32, %arg1: memref<128x40xbf16, #tpu.memory_space<vmem>>, %arg2: memref<40x128xbf16, #tpu.memory_space<vmem>>, %arg3: memref<128x128xf32, #tpu.memory_space<vmem>>, %arg4: memref<8x128xf32, #tpu.memory_space<vmem>>) attributes {dimension_semantics = [#tpu.dimension_semantics<arbitrary>], iteration_bounds = array<i64: 4>, scalar_prefetch = 0 : i64, scratch_operands = 0 : i64, tpu.core_type = #tpu.core_type<tc>, window_params = [{transform_indices = @transform_0, window_bounds = array<i64: 128, 40>}, {pipeline_mode = #tpu.pipeline_mode<synchronous>, transform_indices = @transform_1, window_bounds = array<i64: 40, 128>}, {transform_indices = @transform_2, window_bounds = array<i64: 128, 128>}, {pipeline_mode = #tpu.pipeline_mode<synchronous>, transform_indices = @transform_3, window_bounds = array<i64: 8, 128>}]} {
    %c0 = arith.constant 0 : index
    %c0_0 = arith.constant 0 : index
    %0 = vector.load %arg1[%c0, %c0_0] : memref<128x40xbf16, #tpu.memory_space<vmem>>, vector<128x40xbf16>
    %c0_1 = arith.constant 0 : index
    %c0_2 = arith.constant 0 : index
    %1 = vector.load %arg2[%c0_1, %c0_2] : memref<40x128xbf16, #tpu.memory_space<vmem>>, vector<40x128xbf16>
    %cst = arith.constant dense<0.000000e+00> : vector<128x128xf32>
    %2 = tpu.matmul %0, %1, %cst {dimension_numbers = #tpu.dot_dimension_numbers<[1], [0], [0], [1], [0, 0, 1, 1], [], []>} : vector<128x40xbf16>, vector<40x128xbf16>, vector<128x128xf32> -> vector<128x128xf32>
    %c0_3 = arith.constant 0 : index
    %c0_4 = arith.constant 0 : index
    %3 = vector.load %arg3[%c0_3, %c0_4] : memref<128x128xf32, #tpu.memory_space<vmem>>, vector<128x128xf32>
    tpu.vector_store %arg3[%c0_3, %c0_4], %2 {strides = array<i32>} : memref<128x128xf32, #tpu.memory_space<vmem>>, vector<128x128xf32>,
    %c0_i32 = arith.constant 0 : i32
    %4 = arith.cmpi eq, %arg0, %c0_i32 : i32
    %5 = arith.extui %4 : i1 to i32
    %c0_i32_5 = arith.constant 0 : i32
    %6 = arith.cmpi ne, %5, %c0_i32_5 : i32
    scf.if %6 {
      %cst_13 = arith.constant 0.000000e+00 : f32
      %17 = vector.broadcast %cst_13 : f32 to vector<8x128xf32>
      %c0_14 = arith.constant 0 : index
      %c0_15 = arith.constant 0 : index
      %18 = vector.load %arg4[%c0_14, %c0_15] : memref<8x128xf32, #tpu.memory_space<vmem>>, vector<8x128xf32>
      tpu.vector_store %arg4[%c0_14, %c0_15], %17 {strides = array<i32>} : memref<8x128xf32, #tpu.memory_space<vmem>>, vector<8x128xf32>,
    } else {
    }
    %cst_6 = arith.constant dense<0.000000e+00> : vector<128xf32>
    %7 = vector.multi_reduction <add>, %2, %cst_6 [0] : vector<128x128xf32> to vector<128xf32>
    %8 = vector.shape_cast %7 : vector<128xf32> to vector<1x128xf32>
    %9 = arith.mulf %2, %2 : vector<128x128xf32>
    %cst_7 = arith.constant dense<0.000000e+00> : vector<128xf32>
    %10 = vector.multi_reduction <add>, %9, %cst_7 [0] : vector<128x128xf32> to vector<128xf32>
    %11 = vector.shape_cast %10 : vector<128xf32> to vector<1x128xf32>
    %cst_8 = arith.constant 0.000000e+00 : f32
    %12 = vector.broadcast %cst_8 : f32 to vector<6x128xf32>
    %13 = tpu.concatenate %8, %11, %12 in 0 : vector<1x128xf32>, vector<1x128xf32>, vector<6x128xf32> -> vector<8x128xf32>
    %c0_9 = arith.constant 0 : index
    %c0_10 = arith.constant 0 : index
    %14 = vector.load %arg4[%c0_9, %c0_10] : memref<8x128xf32, #tpu.memory_space<vmem>>, vector<8x128xf32>
    %15 = arith.addf %14, %13 : vector<8x128xf32>
    %c0_11 = arith.constant 0 : index
    %c0_12 = arith.constant 0 : index
    %16 = vector.load %arg4[%c0_11, %c0_12] : memref<8x128xf32, #tpu.memory_space<vmem>>, vector<8x128xf32>
    tpu.vector_store %arg4[%c0_11, %c0_12], %15 {strides = array<i32>} : memref<8x128xf32, #tpu.memory_space<vmem>>, vector<8x128xf32>,
    return
  }
  func.func @transform_0(%arg0: i32) -> (i32, i32) {
    %c0_i32 = arith.constant 0 : i32
    %c0_i32_0 = arith.constant 0 : i32
    return %arg0, %c0_i32 : i32, i32
  }
  func.func @transform_1(%arg0: i32) -> (i32, i32) {
    %c0_i32 = arith.constant 0 : i32
    %c0_i32_0 = arith.constant 0 : i32
    %c0_i32_1 = arith.constant 0 : i32
    return %c0_i32, %c0_i32_0 : i32, i32
  }
  func.func @transform_2(%arg0: i32) -> (i32, i32) {
    %c0_i32 = arith.constant 0 : i32
    %c0_i32_0 = arith.constant 0 : i32
    return %arg0, %c0_i32 : i32, i32
  }
  func.func @transform_3(%arg0: i32) -> (i32, i32) {
    %c0_i32 = arith.constant 0 : i32
    %c0_i32_0 = arith.constant 0 : i32
    %c0_i32_1 = arith.constant 0 : i32
    return %c0_i32, %c0_i32_0 : i32, i32
  }
}

module attributes {stable_mosaic.version = 11 : i64} {
  func.func @_bn_relu_kernel(%arg0: i32, %arg1: memref<128x128xf32, #tpu.memory_space<vmem>>, %arg2: memref<1x128xf32, #tpu.memory_space<vmem>>, %arg3: memref<1x128xf32, #tpu.memory_space<vmem>>, %arg4: memref<128x128xf32, #tpu.memory_space<vmem>>) attributes {dimension_semantics = [#tpu.dimension_semantics<parallel>], iteration_bounds = array<i64: 4>, scalar_prefetch = 0 : i64, scratch_operands = 0 : i64, tpu.core_type = #tpu.core_type<tc>, window_params = [{transform_indices = @transform_0, window_bounds = array<i64: 128, 128>}, {pipeline_mode = #tpu.pipeline_mode<synchronous>, transform_indices = @transform_1, window_bounds = array<i64: 1, 128>}, {pipeline_mode = #tpu.pipeline_mode<synchronous>, transform_indices = @transform_2, window_bounds = array<i64: 1, 128>}, {transform_indices = @transform_3, window_bounds = array<i64: 128, 128>}]} {
    %c0 = arith.constant 0 : index
    %c0_0 = arith.constant 0 : index
    %0 = vector.load %arg1[%c0, %c0_0] : memref<128x128xf32, #tpu.memory_space<vmem>>, vector<128x128xf32>
    %c0_1 = arith.constant 0 : index
    %c0_2 = arith.constant 0 : index
    %1 = vector.load %arg2[%c0_1, %c0_2] : memref<1x128xf32, #tpu.memory_space<vmem>>, vector<1x128xf32>
    %2 = vector.broadcast %1 : vector<1x128xf32> to vector<128x128xf32>
    %3 = arith.mulf %0, %2 : vector<128x128xf32>
    %c0_3 = arith.constant 0 : index
    %c0_4 = arith.constant 0 : index
    %4 = vector.load %arg3[%c0_3, %c0_4] : memref<1x128xf32, #tpu.memory_space<vmem>>, vector<1x128xf32>
    %5 = vector.broadcast %4 : vector<1x128xf32> to vector<128x128xf32>
    %6 = arith.addf %3, %5 : vector<128x128xf32>
    %cst = arith.constant 0.000000e+00 : f32
    %7 = vector.broadcast %cst : f32 to vector<128x128xf32>
    %8 = arith.maximumf %6, %7 : vector<128x128xf32>
    %c0_5 = arith.constant 0 : index
    %c0_6 = arith.constant 0 : index
    %9 = vector.load %arg4[%c0_5, %c0_6] : memref<128x128xf32, #tpu.memory_space<vmem>>, vector<128x128xf32>
    tpu.vector_store %arg4[%c0_5, %c0_6], %8 {strides = array<i32>} : memref<128x128xf32, #tpu.memory_space<vmem>>, vector<128x128xf32>,
    return
  }
  func.func @transform_0(%arg0: i32) -> (i32, i32) {
    %c0_i32 = arith.constant 0 : i32
    %c0_i32_0 = arith.constant 0 : i32
    return %arg0, %c0_i32 : i32, i32
  }
  func.func @transform_1(%arg0: i32) -> (i32, i32) {
    %c0_i32 = arith.constant 0 : i32
    %c0_i32_0 = arith.constant 0 : i32
    %c0_i32_1 = arith.constant 0 : i32
    return %c0_i32, %c0_i32_0 : i32, i32
  }
  func.func @transform_2(%arg0: i32) -> (i32, i32) {
    %c0_i32 = arith.constant 0 : i32
    %c0_i32_0 = arith.constant 0 : i32
    %c0_i32_1 = arith.constant 0 : i32
    return %c0_i32, %c0_i32_0 : i32, i32
  }
  func.func @transform_3(%arg0: i32) -> (i32, i32) {
    %c0_i32 = arith.constant 0 : i32
    %c0_i32_0 = arith.constant 0 : i32
    return %arg0, %c0_i32 : i32, i32
  }
}

</mosaic_0001>

<bundles_post_ra>
// kernel: convolution_block_forward.3
= control target key start
LH: loop header
LB: loop body
LE: loop exit
PB: predicated region body
PF: predicated region fallthrough
CT: control target
= control target key end

     0   :  { %s367_s12 = smov 0   ;;  %s444_s0 = inlined_call_operand.vmem [shape: f32[512,128], index: 0, kind: input, shape index: {}]   ;;  %s445_s1 = inlined_call_operand.vmem [shape: f32[1,128], index: 1, kind: input, shape index: {}]   ;;  %s446_s2 = inlined_call_operand.vmem [shape: f32[1,128], index: 2, kind: input, shape index: {}]   ;;  %s447_s3 = inlined_call_operand.vmem [shape: f32[512,128], index: 3, kind: output, shape index: {}]  }
   0x1 LB: > { %s318_s13 = sadd.s32 4294967295, %s345_s12   ;;  %p322_p0 = scmp.ge.s32.totalorder %s345_s12, 1  ;;  %s345_s12 = sphi %s367_s12, %s13_s12  }
   0x2   : > { %p138_p1 = scmp.lt.s32.totalorder %s345_s12, 5 }
   0x4   : > { %p139_p2 = pnand %p322_p0, %p138_p1 }
   0x5   : > { %s323_s14 = sshll.u32 (!%p139_p2), %s318_s13, 4 }
   0x6   : > { %142 = sbr.rel (%p139_p2) target bundleno = 37 (0x25), region = 32  ;;  %p163_p3 = scmp.lt.s32.totalorder (!%p139_p2), %s323_s14, 63 }
   0xb   : > { %s449_s14 = smov (!%p163_p3, %s323_s14), 63  ;;  %v337_v0 = vld [vmem:[%s445_s1] ss:$0 sm:$0xff] }
   0xc   : > { %s324_s17 = sshll.u32 %s449_s14, 3  ;;  %v386_v1 = vld [vmem:[%s446_s2] ss:$0 sm:$0xff] }
   0xd   : > { %s381_s20 = scalar_lea.vmem %s444_s0, %s324_s17  ;;  %s402_s25 = scalar_lea.vmem %s447_s3, %s324_s17 }
   0xe   : > { %v174_v2 = vld [vmem:[%s381_s20] sm:$0xff]  ;;  %v175_v3 = vld [vmem:[%s381_s20 + $0x8] sm:$0xff]  ;;  %v176_v4 = vld [vmem:[%s381_s20 + $0x10] sm:$0xff] }
   0xf   : > { %v194_v5 = vmul.f32 %v337_v0, %v174_v2  ;;  %v195_v6 = vmul.f32 %v337_v0, %v175_v3  ;;  %v196_v7 = vmul.f32 %v337_v0, %v176_v4  ;;  %v177_v8 = vld [vmem:[%s381_s20 + $0x18] sm:$0xff]  ;;  %v178_v9 = vld [vmem:[%s381_s20 + $0x20] sm:$0xff]  ;;  %v179_v10 = vld [vmem:[%s381_s20 + $0x28] sm:$0xff] }
  0x10   : > { %v197_v11 = vmul.f32 %v337_v0, %v177_v8  ;;  %v198_v12 = vmul.f32 %v337_v0, %v178_v9  ;;  %v199_v13 = vmul.f32 %v337_v0, %v179_v10  ;;  %v180_v14 = vld [vmem:[%s381_s20 + $0x30] sm:$0xff]  ;;  %v181_v15 = vld [vmem:[%s381_s20 + $0x38] sm:$0xff]  ;;  %v182_v24 = vld [vmem:[%s381_s20 + $0x40] sm:$0xff] }
  0x11   : > { %v214_v16 = vadd.f32 %v386_v1, %v194_v5  ;;  %v215_v17 = vadd.f32 %v386_v1, %v195_v6  ;;  %v216_v18 = vadd.f32 %v386_v1, %v196_v7  ;;  %v200_v19 = vmul.f32 %v337_v0, %v180_v14  ;;  %v183_v25 = vld [vmem:[%s381_s20 + $0x48] sm:$0xff]  ;;  %v184_v26 = vld [vmem:[%s381_s20 + $0x50] sm:$0xff]  ;;  %v185_v31 = vld [vmem:[%s381_s20 + $0x58] sm:$0xff] }
  0x12   : > { %v217_v20 = vadd.f32 %v386_v1, %v197_v11  ;;  %v218_v21 = vadd.f32 %v386_v1, %v198_v12  ;;  %v219_v22 = vadd.f32 %v386_v1, %v199_v13  ;;  %v201_v23 = vmul.f32 %v337_v0, %v181_v15  ;;  %v186_v32 = vld [vmem:[%s381_s20 + $0x60] sm:$0xff]  ;;  %v187_v33 = vld [vmem:[%s381_s20 + $0x68] sm:$0xff]  ;;  %v188_v37 = vld [vmem:[%s381_s20 + $0x70] sm:$0xff] }
  0x13   : > { %v230_v27 = vmax.f32 %v214_v16, 0.0  ;;  %v231_v28 = vmax.f32 %v215_v17, 0.0  ;;  %v232_v29 = vmax.f32 %v216_v18, 0.0  ;;  %v220_v30 = vadd.f32 %v386_v1, %v200_v19  ;;  %v189_v42 = vld [vmem:[%s381_s20 + $0x78] sm:$0xff] }
  0x14   : > { %v233_v34 = vmax.f32 %v217_v20, 0.0  ;;  %v234_v35 = vmax.f32 %v218_v21, 0.0  ;;  %v221_v36 = vadd.f32 %v386_v1, %v201_v23  ;;  %v235_v38 = vmax.f32 %v219_v22, 0.0 }
  0x15   : > { %246 = vst [vmem:[%s402_s25] sm:$0xff] %v230_v27  ;;  %v202_v39 = vmul.f32 %v337_v0, %v182_v24  ;;  %v203_v40 = vmul.f32 %v337_v0, %v183_v25  ;;  %v204_v41 = vmul.f32 %v337_v0, %v184_v26  ;;  %v236_v43 = vmax.f32 %v220_v30, 0.0 }
  0x16   : > { %247 = vst [vmem:[%s402_s25 + $0x8] sm:$0xff] %v231_v28  ;;  %v205_v44 = vmul.f32 %v337_v0, %v185_v31  ;;  %v206_v45 = vmul.f32 %v337_v0, %v186_v32  ;;  %v207_v46 = vmul.f32 %v337_v0, %v187_v33  ;;  %v208_v50 = vmul.f32 %v337_v0, %v188_v37 }
  0x17   : > { %248 = vst [vmem:[%s402_s25 + $0x10] sm:$0xff] %v232_v29  ;;  %v222_v47 = vadd.f32 %v386_v1, %v202_v39  ;;  %v223_v48 = vadd.f32 %v386_v1, %v203_v40  ;;  %v224_v49 = vadd.f32 %v386_v1, %v204_v41  ;;  %v237_v51 = vmax.f32 %v221_v36, 0.0 }
  0x18   : > { %249 = vst [vmem:[%s402_s25 + $0x18] sm:$0xff] %v233_v34  ;;  %v225_v52 = vadd.f32 %v386_v1, %v205_v44  ;;  %v209_v53 = vmul.f32 %v337_v0, %v189_v42  ;;  %v226_v55 = vadd.f32 %v386_v1, %v206_v45  ;;  %v227_v57 = vadd.f32 %v386_v1, %v207_v46 }
  0x19   : > { %250 = vst [vmem:[%s402_s25 + $0x20] sm:$0xff] %v234_v35  ;;  %v238_v54 = vmax.f32 %v222_v47, 0.0  ;;  %v239_v56 = vmax.f32 %v223_v48, 0.0  ;;  %v240_v58 = vmax.f32 %v224_v49, 0.0  ;;  %v228_v59 = vadd.f32 %v386_v1, %v208_v50 }
  0x1a   : > { %251 = vst [vmem:[%s402_s25 + $0x28] sm:$0xff] %v235_v38  ;;  %v241_v60 = vmax.f32 %v225_v52, 0.0  ;;  %v229_v61 = vadd.f32 %v386_v1, %v209_v53  ;;  %v242_v62 = vmax.f32 %v226_v55, 0.0  ;;  %v243_v63 = vmax.f32 %v227_v57, 0.0 }
  0x1b   : > { %252 = vst [vmem:[%s402_s25 + $0x30] sm:$0xff] %v236_v43  ;;  %v244_v0 = vmax.f32 %v228_v59, 0.0 }
  0x1c   : > { %253 = vst [vmem:[%s402_s25 + $0x38] sm:$0xff] %v237_v51  ;;  %v245_v2 = vmax.f32 %v229_v61, 0.0 }
  0x1d   : > { %254 = vst [vmem:[%s402_s25 + $0x40] sm:$0xff] %v238_v54 }
  0x1e   : > { %255 = vst [vmem:[%s402_s25 + $0x48] sm:$0xff] %v239_v56 }
  0x1f   : > { %256 = vst [vmem:[%s402_s25 + $0x50] sm:$0xff] %v240_v58 }
  0x20   : > { %257 = vst [vmem:[%s402_s25 + $0x58] sm:$0xff] %v241_v60 }
  0x21   : > { %258 = vst [vmem:[%s402_s25 + $0x60] sm:$0xff] %v242_v62 }
  0x22   : > { %259 = vst [vmem:[%s402_s25 + $0x68] sm:$0xff] %v243_v63 }
  0x23   : > { %260 = vst [vmem:[%s402_s25 + $0x70] sm:$0xff] %v244_v0 }
  0x24   : > { %261 = vst [vmem:[%s402_s25 + $0x78] sm:$0xff] %v245_v2 }
  0x25 PF: > { %s13_s12 = sadd.s32 1, %s345_s12  }
  0x26   : > { %p10_p4 = scmp.ge.s32.totalorder %s13_s12, 6  }
  0x28   :  { %12 = sbr.rel (!%p10_p4) target bundleno = 1 (0x1), region = 62 }

// kernel: convolution_block_forward.2
= control target key start
LH: loop header
LB: loop body
LE: loop exit
PB: predicated region body
PF: predicated region fallthrough
CT: control target
= control target key end

     0   :  { %s592_s12 = smov 0   ;;  %s667_s0 = inlined_call_operand.vmem [shape: bf16[512,40], index: 0, kind: input, shape index: {}]   ;;  %s668_s1 = inlined_call_operand.vmem [shape: bf16[40,128], index: 1, kind: input, shape index: {}]   ;;  %s669_s2 = inlined_call_operand.vmem [shape: f32[512,128], index: 2, kind: output, shape index: {0}]   ;;  %s670_s3 = inlined_call_operand.vmem [shape: f32[8,128], index: 3, kind: output, shape index: {1}]  }
   0x1 LB: > { %s475_s13 = sadd.s32 4294967295, %s569_s12   ;;  %p479_p0 = scmp.ge.s32.totalorder %s569_s12, 1  ;;  %s569_s12 = sphi %s592_s12, %s14_s12  }
   0x2   : > { %p136_p1 = scmp.lt.s32.totalorder %s569_s12, 5 }
   0x4   : > { %p137_p2 = pnand %p479_p0, %p136_p1 }
   0x5   : > { %s480_s16 = sshll.u32 (!%p137_p2), %s475_s13, 4  ;;  %p532_p4 = scmp.ne.s32.totalorder (!%p137_p2), %s475_s13, 0 }
   0x6   : > { %140 = sbr.rel (%p137_p2) target bundleno = 238 (0xee), region = 28  ;;  %p161_p3 = scmp.lt.s32.totalorder (!%p137_p2), %s480_s16, 63 }
   0xb   : > { %v193_v0 = vld [vmem:[%s668_s1 + $0x10] sm:$0xf]  ;;  %vm274_vm0 = vcmask 1043456   ;;  %s672_s16 = smov (!%p161_p3, %s480_s16), 63  ;;  %v544_v4 = vld [vmem:[%s668_s1 + $0x8] sm:$0xff]  ;;  %v543_v5 = vld [vmem:[%s668_s1] sm:$0xff] }
   0xc   : > { %v243_v1 = vunpack.c.l.b16 %v193_v0  ;;  %s481_s19 = sshll.u32 %s672_s16, 2  ;;  %vm249_vm1 = vcmask 326656   ;;  %s483_s25 = sshll.u32 %s672_s16, 3 }
   0xd   : > { %s164_s24 = scalar_lea.vmem %s667_s0, %s481_s19  ;;  %s629_s28 = scalar_lea.vmem %s669_s2, %s483_s25 }
   0xe   : > { %v246_v2 = vpack.c.b16 %v243_v1, %v243_v1  ;;  %v535_v6 = vld [vmem:[%s164_s24] sm:$0xff]  ;;  %v537_v7 = vld [vmem:[%s164_s24 + $0x10] sm:$0xff]  ;;  %v536_v10 = vld [vmem:[%s164_s24 + $0x8] sm:$0xff] }
   0xf   : > { %v539_v8 = vld [vmem:[%s164_s24 + $0x20] sm:$0xff]  ;;  %v541_v9 = vld [vmem:[%s164_s24 + $0x30] sm:$0xff]  ;;  %v538_v11 = vld [vmem:[%s164_s24 + $0x18] sm:$0xff] }
  0x10   : > { %v276_v3 = vsel %vm274_vm0, %v246_v2, 0  ;;  %v540_v12 = vld [vmem:[%s164_s24 + $0x28] sm:$0xff]  ;;  %v542_v13 = vld [vmem:[%s164_s24 + $0x38] sm:$0xff] }
  0x11   : > { %283 = vmatpush.bf16.msra.mxu0 %v276_v3  ;;  %545 = vmatpush.bf16.msra.mxu1 %v276_v3 }
  0x12   : > { %546 = vmatpush.bf16.msra.mxu2 %v276_v3  ;;  %547 = vmatpush.bf16.msra.mxu3 %v276_v3 }
  0x15   : > { %284 = vmatpush.bf16.msra.mxu0 %v544_v4  ;;  %548 = vmatpush.bf16.msra.mxu1 %v544_v4 }
  0x16   : > { %549 = vmatpush.bf16.msra.mxu2 %v544_v4  ;;  %550 = vmatpush.bf16.msra.mxu3 %v544_v4 }
  0x19   : > { %285 = vmatpush.bf16.msra.mxu0 %v543_v5  ;;  %551 = vmatpush.bf16.msra.mxu1 %v543_v5 }
  0x1a   : > { %552 = vmatpush.bf16.msra.mxu2 %v543_v5  ;;  %553 = vmatpush.bf16.msra.mxu3 %v543_v5 }
  0x1c   : > { %524 = vmatmul.msk.bf16.vlgmr.msra.gmra.mxu0 %vm249_vm1, %v535_v6  ;;  %526 = vmatmul.msk.bf16.vlgmr.msra.gmra.mxu1 %vm249_vm1, %v537_v7 }
  0x1d   : > { %528 = vmatmul.msk.bf16.vlgmr.msra.gmra.mxu2 %vm249_vm1, %v539_v8  ;;  %530 = vmatmul.msk.bf16.vlgmr.msra.gmra.mxu3 %vm249_vm1, %v541_v9 }
  0x2c   : > { %525 = vmatmul.msk.bf16.gmra.mxu0 %vm249_vm1, %v536_v10  ;;  %527 = vmatmul.msk.bf16.gmra.mxu1 %vm249_vm1, %v538_v11 }
  0x2d   : > { %529 = vmatmul.msk.bf16.gmra.mxu2 %vm249_vm1, %v540_v12  ;;  %531 = vmatmul.msk.bf16.gmra.mxu3 %vm249_vm1, %v542_v13 }
  0x99   : > { %v287_v14 = vpop.f32.mrf.mxu0  ;;  %v297_v15 = vpop.f32.mrf.mxu1 }
  0x9a   : > { %327 = vst [vmem:[%s629_s28] sm:$0xff] %v287_v14 }
  0x9b   : > { %331 = vst [vmem:[%s629_s28 + $0x20] sm:$0xff] %v297_v15 }
  0xa0   : > { %v307_v16 = vpop.f32.mrf.mxu2  ;;  %v633_v17 = vpop.f32.mrf.mxu3 }
  0xa1   : > { %335 = vst [vmem:[%s629_s28 + $0x40] sm:$0xff] %v307_v16  ;;  %v289_v18 = vpop.f32.mrf.mxu0  ;;  %v299_v19 = vpop.f32.mrf.mxu1 }
  0xa2   : > { %339 = vst [vmem:[%s629_s28 + $0x60] sm:$0xff] %v633_v17 }
  0xa3   : > { %328 = vst [vmem:[%s629_s28 + $0x8] sm:$0xff] %v289_v18 }
  0xa4   : > { %332 = vst [vmem:[%s629_s28 + $0x28] sm:$0xff] %v299_v19 }
  0xa8   : > { %v309_v20 = vpop.f32.mrf.mxu2  ;;  %v319_v21 = vpop.f32.mrf.mxu3 }
  0xa9   : > { %336 = vst [vmem:[%s629_s28 + $0x48] sm:$0xff] %v309_v20  ;;  %v292_v22 = vpop.f32.mrf.mxu0  ;;  %v302_v23 = vpop.f32.mrf.mxu1 }
  0xaa   : > { %340 = vst [vmem:[%s629_s28 + $0x68] sm:$0xff] %v319_v21 }
  0xab   : > { %329 = vst [vmem:[%s629_s28 + $0x10] sm:$0xff] %v292_v22 }
  0xac   : > { %333 = vst [vmem:[%s629_s28 + $0x30] sm:$0xff] %v302_v23 }
  0xb0   : > { %v312_v24 = vpop.f32.mrf.mxu2  ;;  %v322_v25 = vpop.f32.mrf.mxu3 }
  0xb1   : > { %337 = vst [vmem:[%s629_s28 + $0x50] sm:$0xff] %v312_v24  ;;  %v294_v26 = vpop.f32.mrf.mxu0  ;;  %v304_v27 = vpop.f32.mrf.mxu1 }
  0xb2   : > { %341 = vst [vmem:[%s629_s28 + $0x70] sm:$0xff] %v322_v25 }
  0xb3   : > { %330 = vst [vmem:[%s629_s28 + $0x18] sm:$0xff] %v294_v26 }
  0xb4   : > { %334 = vst [vmem:[%s629_s28 + $0x38] sm:$0xff] %v304_v27 }
  0xb6   : > { %346 = sbr.rel (%p532_p4) target bundleno = 189 (0xbd), region = 32 }
  0xb8   : > { %v314_v28 = vpop.f32.mrf.mxu2  ;;  %v324_v29 = vpop.f32.mrf.mxu3 }
  0xb9   : > { %338 = vst [vmem:[%s629_s28 + $0x58] sm:$0xff] %v314_v28 }
  0xba   : > { %342 = vst [vmem:[%s629_s28 + $0x78] sm:$0xff] %v324_v29 }
  0xbb   : > { %v571_v30 = vmov 0.0  }
  0xbc   : > { %347 = vst [vmem:[%s670_s3] sm:$0xff] %v571_v30 }
  0xbd PF: > { %v348_v31 = vadd.f32 %v289_v18, %v287_v14  ;;  %v369_v32 = vmul.f32 %v287_v14, %v287_v14  ;;  %v370_v33 = vmul.f32 %v289_v18, %v289_v18  ;;  %v371_v35 = vmul.f32 %v292_v22, %v292_v22 }
  0xbe   : > { %v372_v37 = vmul.f32 %v294_v26, %v294_v26  ;;  %v373_v40 = vmul.f32 %v297_v15, %v297_v15  ;;  %v374_v43 = vmul.f32 %v299_v19, %v299_v19  ;;  %v375_v46 = vmul.f32 %v302_v23, %v302_v23 }
  0xbf   : > { %v349_v34 = vadd.f32 %v348_v31, %v292_v22  ;;  %v385_v38 = vadd.f32 %v370_v33, %v369_v32  ;;  %v376_v49 = vmul.f32 %v304_v27, %v304_v27  ;;  %v377_v52 = vmul.f32 %v307_v16, %v307_v16 }
  0xc0   : > { %v378_v55 = vmul.f32 %v309_v20, %v309_v20  ;;  %v379_v58 = vmul.f32 %v312_v24, %v312_v24  ;;  %v380_v61 = vmul.f32 %v314_v28, %v314_v28  ;;  %v381_v0 = vmul.f32 %v633_v17, %v633_v17 }
  0xc1   : > { %v350_v36 = vadd.f32 %v349_v34, %v294_v26  ;;  %v386_v41 = vadd.f32 %v385_v38, %v371_v35  ;;  %v382_v3 = vmul.f32 %v319_v21, %v319_v21  ;;  %v383_v6 = vmul.f32 %v322_v25, %v322_v25 }
  0xc2   : > { %v384_v9 = vmul.f32 %v324_v29, %v324_v29  ;;  %vm406_vm2 = vcmask 1040384   ;;  %vm408_vm3 = vcmask 1041408  }
  0xc3   : > { %v351_v39 = vadd.f32 %v350_v36, %v297_v15  ;;  %v387_v44 = vadd.f32 %v386_v41, %v372_v37 }
  0xc5   : > { %v352_v42 = vadd.f32 %v351_v39, %v299_v19  ;;  %v388_v47 = vadd.f32 %v387_v44, %v373_v40 }
  0xc7   : > { %v353_v45 = vadd.f32 %v352_v42, %v302_v23  ;;  %v389_v50 = vadd.f32 %v388_v47, %v374_v43 }
  0xc9   : > { %v354_v48 = vadd.f32 %v353_v45, %v304_v27  ;;  %v390_v53 = vadd.f32 %v389_v50, %v375_v46 }
  0xcb   : > { %v355_v51 = vadd.f32 %v354_v48, %v307_v16  ;;  %v391_v56 = vadd.f32 %v390_v53, %v376_v49 }
  0xcd   : > { %v356_v54 = vadd.f32 %v355_v51, %v309_v20  ;;  %v392_v59 = vadd.f32 %v391_v56, %v377_v52 }
  0xcf   : > { %v357_v57 = vadd.f32 %v356_v54, %v312_v24  ;;  %v393_v62 = vadd.f32 %v392_v59, %v378_v55 }
  0xd1   : > { %v358_v60 = vadd.f32 %v357_v57, %v314_v28  ;;  %v394_v1 = vadd.f32 %v393_v62, %v379_v58 }
  0xd3   : > { %v359_v63 = vadd.f32 %v358_v60, %v633_v17  ;;  %v395_v4 = vadd.f32 %v394_v1, %v380_v61 }
  0xd5   : > { %v360_v2 = vadd.f32 %v359_v63, %v319_v21  ;;  %v396_v7 = vadd.f32 %v395_v4, %v381_v0 }
  0xd7   : > { %v361_v5 = vadd.f32 %v360_v2, %v322_v25  ;;  %v397_v10 = vadd.f32 %v396_v7, %v382_v3  ;;  %v410_v25 = vld [vmem:[%s670_s3] sm:$0xff] }
  0xd9   : > { %v362_v8 = vadd.f32 %v361_v5, %v324_v29  ;;  %v398_v12 = vadd.f32 %v397_v10, %v383_v6 }
  0xdb   : > { %v363_v11 = vrot.slane %v362_v8, 4  ;;  %v399_v14 = vadd.f32 %v398_v12, %v384_v9 }
  0xdd   : > { %v364_v13 = vadd.f32 %v363_v11, %v362_v8  ;;  %v400_v16 = vrot.slane %v399_v14, 4 }
  0xdf   : > { %v365_v15 = vrot.slane %v364_v13, 2  ;;  %v401_v19 = vadd.f32 %v400_v16, %v399_v14 }
  0xe1   : > { %v366_v18 = vadd.f32 %v365_v15, %v364_v13  ;;  %v402_v17 = vrot.slane %v401_v19, 2 }
  0xe3   : > { %v367_v20 = vrot.slane %v366_v18, 1  ;;  %v403_v22 = vadd.f32 %v402_v17, %v401_v19 }
  0xe5   : > { %v368_v23 = vadd.f32 %v367_v20, %v366_v18  ;;  %v404_v21 = vrot.slane %v403_v22, 1 }
  0xe7   : > { %v405_v24 = vadd.f32 %v404_v21, %v403_v22 }
  0xe9   : > { %v407_v26 = vsel %vm406_vm2, %v368_v23, %v405_v24 }
  0xea   : > { %v409_v27 = vsel %vm408_vm3, %v407_v26, 0.0 }
  0xeb   : > { %v411_v28 = vadd.f32 %v410_v25, %v409_v27 }
  0xed   : > { %412 = vst [vmem:[%s670_s3] sm:$0xff] %v411_v28 }
  0xee PF: > { %s14_s12 = sadd.s32 1, %s569_s12  }
  0xef   : > { %p11_p5 = scmp.ge.s32.totalorder %s14_s12, 6  }
  0xf1   :  { %13 = sbr.rel (!%p11_p5) target bundleno = 1 (0x1), region = 70 }

</bundles_post_ra>
